<compile_context>
chip_gen: v7x
topology: tpu7x:2x2x1
jax: 0.10.0
libtpu: 0.0.40
codegen_flags: <defaults>
</compile_context>

<pallas_src>
import functools

import jax
import jax.numpy as jnp
from jax.experimental import pallas as pl
from jax.experimental.pallas import tpu as pltpu


def _fast_pow(x, exponent, clamp_base=False):
    """x**exponent; repeated multiplies (VPU) for small integer exponents
    instead of float pow (which lowers to exp(y*log(x)) on the single EUP)."""
    e = float(exponent)
    e_int = int(round(e))
    if abs(e - e_int) < 1e-9 and 1 <= e_int <= 16:
        result = None
        base = x
        n = e_int
        while n:                       # exponentiation by squaring
            if n & 1:
                result = base if result is None else result * base
            n >>= 1
            if n:
                base = base * base
        return result
    base = jnp.maximum(x, 0.0) if clamp_base else x
    return jnp.power(base, jnp.float32(e))


def _focal_loss_kernel(pred_ref, gt_ref, out_ref, *, rows, tile_rows, gamma, inv_alpha):
    i = pl.program_id(1)

    # The output block is resident across the reduction axis -> accumulator.
    @pl.when(i == 0)
    def _():
        out_ref[...] = jnp.zeros_like(out_ref)

    # Unclamped global tile index -> row-validity mask for partial/redundant
    # boundary tiles (their buffer rows may contain garbage).
    t = pl.program_id(0) * pl.num_programs(1) + i
    row0 = t * tile_rows
    local_row = jax.lax.broadcasted_iota(jnp.int32, (tile_rows, 1), 0)
    valid = (row0 + local_row) < rows          # (tile_rows, 1), broadcasts over lanes

    p = pred_ref[...].astype(jnp.float32)
    g = gt_ref[...].astype(jnp.float32)
    # Invalid rows -> sentinel (pred=0.5, gt=2.0): finite log, exactly-zero factor.
    p = jnp.where(valid, p, 0.5)
    g = jnp.where(valid, g, 2.0)

    is_pos = g == 1.0
    omp = 1.0 - p

    # Single log per element: pos and neg element sets are disjoint.
    lg = jnp.log(jnp.where(is_pos, p, omp))

    pos_w = _fast_pow(omp, gamma)                                   # (1-p)^gamma
    neg_w = p * p * _fast_pow(1.0 - g, inv_alpha, clamp_base=True)  # p^2 (1-g)^(1/alpha)
    factor = jnp.where(is_pos, pos_w, jnp.where(g < 1.0, neg_w, 0.0))

    contrib = lg * factor                       # (tile_rows, 128)
    # Fold rows onto the resident (8, 128) accumulator with plain VPU adds
    # (no per-step XLU cross-lane reduction, no sub-128-lane masked store).
    out_ref[...] += contrib.reshape(tile_rows // 8, 8, 128).sum(axis=0)


def focal_loss(pred, gt, *, alpha=0.25, gamma=2.0, tile_rows=1024):
    """pred, gt: same shape (e.g. NCHW), pred in (0, 1). Returns scalar f32 loss."""
    assert pred.shape == gt.shape
    lanes = 128
    flat_p = pred.reshape(-1)
    flat_g = gt.reshape(-1)
    n = flat_p.shape[0]

    # Only pad the lane tail (if any) so the flat array views as (rows, 128);
    # sentinel values (pred=0.5, gt=2.0) contribute exactly 0 under `factor`.
    lane_pad = (-n) % lanes
    if lane_pad:
        flat_p = jnp.pad(flat_p, (0, lane_pad),
                         constant_values=jnp.asarray(0.5, flat_p.dtype))
        flat_g = jnp.pad(flat_g, (0, lane_pad),
                         constant_values=jnp.asarray(2.0, flat_g.dtype))

    P = flat_p.reshape(-1, lanes)
    G = flat_g.reshape(-1, lanes)
    rows = P.shape[0]

    # Large, 8-aligned row tiles; clamp for small inputs. 1024x128 f32 =
    # 512 KiB per input block -> 2 MiB with double buffering: fits the scoped
    # VMEM default on v5e/v6e/v7x with headroom.
    tile_rows = int(max(8, min(tile_rows, ((rows + 7) // 8) * 8)))
    num_tiles = pl.cdiv(rows, tile_rows)

    # Shard the reduction across TensorCores on v7x (leading "parallel" axis);
    # on single-TC v5e/v6e this is just a trivial outer loop.
    n_split = 2 if num_tiles >= 2 else 1
    tiles_per_split = pl.cdiv(num_tiles, n_split)

    def in_map(s, i):
        t = s * tiles_per_split + i
        # Clamp redundant tail tiles in-bounds; their rows are masked in-kernel.
        return (jnp.minimum(t, num_tiles - 1), 0)

    kernel = functools.partial(
        _focal_loss_kernel,
        rows=rows,
        tile_rows=tile_rows,
        gamma=gamma,
        inv_alpha=1.0 / alpha,
    )

    out = pl.pallas_call(
        kernel,
        out_shape=jax.ShapeDtypeStruct((n_split * 8, lanes), jnp.float32),
        grid_spec=pltpu.PrefetchScalarGridSpec(
            num_scalar_prefetch=0,
            grid=(n_split, tiles_per_split),
            in_specs=[
                pl.BlockSpec((tile_rows, lanes), in_map),
                pl.BlockSpec((tile_rows, lanes), in_map),
            ],
            out_specs=pl.BlockSpec((8, lanes), lambda s, i: (s, 0)),
        ),
        compiler_params=pltpu.CompilerParams(
            dimension_semantics=("parallel", "arbitrary"),
        ),
    )(P, G)

    # Per-core lane-dense partial sums -> scalar; loss = -(pos_loss + neg_loss).
    return -jnp.sum(out)


def _focal_loss_ref(pred, gt, alpha=0.25, gamma=2.0):
    pred = pred.astype(jnp.float32)
    gt = gt.astype(jnp.float32)
    pos_inds = (gt == 1.0).astype(jnp.float32)
    neg_inds = (gt < 1.0).astype(jnp.float32)
    neg_weights = jnp.power(1.0 - gt, 1.0 / alpha)
    pos_loss = jnp.log(pred) * jnp.power(1.0 - pred, gamma) * pos_inds
    neg_loss = jnp.log(1.0 - pred) * pred * pred * neg_weights * neg_inds
    return -(jnp.sum(pos_loss) + jnp.sum(neg_loss))


if __name__ == "__main__":
    key = jax.random.PRNGKey(0)
    k_pred, k_gt, k_pos = jax.random.split(key, 3)

    B, C, H, W = 2, 4, 16, 16  # NCHW, like the CenterNet heatmap head output

    # pred: sigmoid output in (0, 1)
    pred = jax.nn.sigmoid(jax.random.normal(k_pred, (B, C, H, W), dtype=jnp.float32))
    # gt: gaussian-ish heatmap values in [0, 1), with a few exact-1 peaks
    gt = jax.random.uniform(k_gt, (B, C, H, W), dtype=jnp.float32, maxval=0.999)
    peak_mask = jax.random.uniform(k_pos, (B, C, H, W)) > 0.97
    gt = jnp.where(peak_mask, 1.0, gt)

    loss = focal_loss(pred, gt)
    loss = jax.block_until_ready(loss)

    ref = _focal_loss_ref(pred, gt)
    assert jnp.allclose(loss, ref, rtol=1e-4, atol=1e-3), (loss, ref)

    print("KERNEL_OK")
</pallas_src>

<mosaic_0001>
module attributes {stable_mosaic.version = 11 : i64} {
  func.func @_focal_loss_kernel(%arg0: i32, %arg1: i32, %arg2: memref<16x128xf32, #tpu.memory_space<vmem>>, %arg3: memref<16x128xf32, #tpu.memory_space<vmem>>, %arg4: memref<8x128xf32, #tpu.memory_space<vmem>>) attributes {dimension_semantics = [#tpu.dimension_semantics<parallel>, #tpu.dimension_semantics<arbitrary>], iteration_bounds = array<i64: 1, 1>, scalar_prefetch = 0 : i64, scratch_operands = 0 : i64, tpu.core_type = #tpu.core_type<tc>, window_params = [{transform_indices = @transform_0, window_bounds = array<i64: 16, 128>}, {transform_indices = @transform_1, window_bounds = array<i64: 16, 128>}, {transform_indices = @transform_2, window_bounds = array<i64: 8, 128>}]} {
    %c0_i32 = arith.constant 0 : i32
    %0 = arith.cmpi eq, %arg1, %c0_i32 : i32
    %1 = arith.extui %0 : i1 to i32
    %c0_i32_0 = arith.constant 0 : i32
    %2 = arith.cmpi ne, %1, %c0_i32_0 : i32
    scf.if %2 {
      %cst_16 = arith.constant 0.000000e+00 : f32
      %45 = vector.broadcast %cst_16 : f32 to vector<8x128xf32>
      %c0_17 = arith.constant 0 : index
      %c0_18 = arith.constant 0 : index
      %46 = vector.load %arg4[%c0_17, %c0_18] : memref<8x128xf32, #tpu.memory_space<vmem>>, vector<8x128xf32>
      tpu.vector_store %arg4[%c0_17, %c0_18], %45 {strides = array<i32>} : memref<8x128xf32, #tpu.memory_space<vmem>>, vector<8x128xf32>,
    } else {
    }
    %c1_i32 = arith.constant 1 : i32
    %3 = arith.muli %arg0, %c1_i32 : i32
    %4 = arith.addi %3, %arg1 : i32
    %c16_i32 = arith.constant 16 : i32
    %5 = arith.muli %4, %c16_i32 : i32
    %6 = tpu.iota {dimensions = array<i32: 0>} : vector<16x1xi32>
    %7 = vector.broadcast %5 : i32 to vector<16x1xi32>
    %8 = arith.addi %7, %6 : vector<16x1xi32>
    %c16_i32_1 = arith.constant 16 : i32
    %9 = vector.broadcast %c16_i32_1 : i32 to vector<16x1xi32>
    %10 = arith.cmpi slt, %8, %9 : vector<16x1xi32>
    %c0 = arith.constant 0 : index
    %c0_2 = arith.constant 0 : index
    %11 = vector.load %arg2[%c0, %c0_2] : memref<16x128xf32, #tpu.memory_space<vmem>>, vector<16x128xf32>
    %c0_3 = arith.constant 0 : index
    %c0_4 = arith.constant 0 : index
    %12 = vector.load %arg3[%c0_3, %c0_4] : memref<16x128xf32, #tpu.memory_space<vmem>>, vector<16x128xf32>
    %cst = arith.constant 5.000000e-01 : f32
    %13 = vector.shape_cast %10 : vector<16x1xi1> to vector<16x1xi1>
    %14 = vector.broadcast %13 : vector<16x1xi1> to vector<16x128xi1>
    %15 = vector.broadcast %cst : f32 to vector<16x128xf32>
    %16 = arith.select %14, %11, %15 : vector<16x128xi1>, vector<16x128xf32>
    %cst_5 = arith.constant 2.000000e+00 : f32
    %17 = vector.shape_cast %10 : vector<16x1xi1> to vector<16x1xi1>
    %18 = vector.broadcast %17 : vector<16x1xi1> to vector<16x128xi1>
    %19 = vector.broadcast %cst_5 : f32 to vector<16x128xf32>
    %20 = arith.select %18, %12, %19 : vector<16x128xi1>, vector<16x128xf32>
    %cst_6 = arith.constant 1.000000e+00 : f32
    %21 = vector.broadcast %cst_6 : f32 to vector<16x128xf32>
    %22 = arith.cmpf oeq, %20, %21 : vector<16x128xf32>
    %cst_7 = arith.constant 1.000000e+00 : f32
    %23 = vector.broadcast %cst_7 : f32 to vector<16x128xf32>
    %24 = arith.subf %23, %16 : vector<16x128xf32>
    %25 = arith.select %22, %16, %24 : vector<16x128xi1>, vector<16x128xf32>
    %26 = math.log %25 : vector<16x128xf32>
    %27 = arith.mulf %24, %24 : vector<16x128xf32>
    %28 = arith.mulf %16, %16 : vector<16x128xf32>
    %cst_8 = arith.constant 1.000000e+00 : f32
    %29 = vector.broadcast %cst_8 : f32 to vector<16x128xf32>
    %30 = arith.subf %29, %20 : vector<16x128xf32>
    %31 = arith.mulf %30, %30 : vector<16x128xf32>
    %32 = arith.mulf %31, %31 : vector<16x128xf32>
    %33 = arith.mulf %28, %32 : vector<16x128xf32>
    %cst_9 = arith.constant 1.000000e+00 : f32
    %34 = vector.broadcast %cst_9 : f32 to vector<16x128xf32>
    %35 = arith.cmpf olt, %20, %34 : vector<16x128xf32>
    %cst_10 = arith.constant 0.000000e+00 : f32
    %36 = vector.broadcast %cst_10 : f32 to vector<16x128xf32>
    %37 = arith.select %35, %33, %36 : vector<16x128xi1>, vector<16x128xf32>
    %38 = arith.select %22, %27, %37 : vector<16x128xi1>, vector<16x128xf32>
    %39 = arith.mulf %26, %38 : vector<16x128xf32>
    %c0_11 = arith.constant 0 : index
    %c0_12 = arith.constant 0 : index
    %40 = vector.load %arg4[%c0_11, %c0_12] : memref<8x128xf32, #tpu.memory_space<vmem>>, vector<8x128xf32>
    %41 = vector.shape_cast %39 : vector<16x128xf32> to vector<2x8x128xf32>
    %cst_13 = arith.constant dense<0.000000e+00> : vector<8x128xf32>
    %42 = vector.multi_reduction <add>, %41, %cst_13 [0] : vector<2x8x128xf32> to vector<8x128xf32>
    %43 = arith.addf %40, %42 : vector<8x128xf32>
    %c0_14 = arith.constant 0 : index
    %c0_15 = arith.constant 0 : index
    %44 = vector.load %arg4[%c0_14, %c0_15] : memref<8x128xf32, #tpu.memory_space<vmem>>, vector<8x128xf32>
    tpu.vector_store %arg4[%c0_14, %c0_15], %43 {strides = array<i32>} : memref<8x128xf32, #tpu.memory_space<vmem>>, vector<8x128xf32>,
    return
  }
  func.func @transform_0(%arg0: i32, %arg1: i32) -> (i32, i32) {
    %c1_i32 = arith.constant 1 : i32
    %0 = arith.muli %arg0, %c1_i32 : i32
    %1 = arith.addi %0, %arg1 : i32
    %c0_i32 = arith.constant 0 : i32
    %2 = arith.minsi %1, %c0_i32 : i32
    %c0_i32_0 = arith.constant 0 : i32
    %c0_i32_1 = arith.constant 0 : i32
    return %2, %c0_i32_0 : i32, i32
  }
  func.func @transform_1(%arg0: i32, %arg1: i32) -> (i32, i32) {
    %c1_i32 = arith.constant 1 : i32
    %0 = arith.muli %arg0, %c1_i32 : i32
    %1 = arith.addi %0, %arg1 : i32
    %c0_i32 = arith.constant 0 : i32
    %2 = arith.minsi %1, %c0_i32 : i32
    %c0_i32_0 = arith.constant 0 : i32
    %c0_i32_1 = arith.constant 0 : i32
    return %2, %c0_i32_0 : i32, i32
  }
  func.func @transform_2(%arg0: i32, %arg1: i32) -> (i32, i32) {
    %c0_i32 = arith.constant 0 : i32
    %c0_i32_0 = arith.constant 0 : i32
    return %arg0, %c0_i32 : i32, i32
  }
}

</mosaic_0001>

<bundles_post_ra>
// kernel: tpu_custom_call.1
= control target key start
LH: loop header
LB: loop body
LE: loop exit
PB: predicated region body
PF: predicated region fallthrough
CT: control target
= control target key end

     0   :  { %7 = vsyncpa [#allocation3], 0  ;;  %s283_s0 = inlined_call_operand.hbm [shape: f32[16,128], index: 0, kind: input, shape index: {}]   ;;  %s284_s1 = inlined_call_operand.hbm [shape: f32[16,128], index: 1, kind: input, shape index: {}]   ;;  %s285_s2 = inlined_call_operand.hbm [shape: f32[8,128], index: 2, kind: output, shape index: {}]  }
   0x1   :  { %8 = vsyncpa [#allocation6], 0 }
   0x2   :  { %9 = vsyncpa [#allocation4], 0  ;;  %s223_s9 = smov [#allocation2]   ;;  %s151_s13 = scalar_lea.hbm %s283_s0, 256 }
   0x3   :  { %s21_s10 = sshll.u32 %s223_s9, 4  ;;  %p152_p0 = scmp.ne.s32.totalorder %s283_s0, %s151_s13  ;;  %s22_s10 = int_to_ptr.vmem [resolvable:$true] %s21_s10 }
   0x4   :  { %p155_p1 = scmp.lt.u32.totalorder %s151_s13, %s283_s0 }
   0x6   :  { %p157_p2 = pnand %p155_p1, %p152_p0 }
   0x8   :  { %160 = shalt.err (!%p157_p2)
}
   0x9   :  { %s161_s18 = scalar_lea.vmem %s22_s10, 256  ;;  %p166_p4 = scmp.lt.s32.totalorder %s22_s10, %s22_s10 }
   0xa   :  { %p162_p3 = scmp.ne.s32.totalorder %s22_s10, %s161_s18  ;;  %p167_p5 = scmp.lt.s32.totalorder %s161_s18, %s161_s18 }
   0xc   :  { %p168_p6 = por %p167_p5, %p166_p4 }
   0xe   :  { %p169_p7 = pnand %p168_p6, %p162_p3 }
  0x10   :  { %172 = shalt.err (!%p169_p7)
}
  0x11   :  { %s224_s19 = smov 128   ;;  %s225_s20 = smov 8  }
  0x12   :  { %27 = dma.hbm_to_vmem [thread:$0]  %s283_s0, 256, %s22_s10, [#allocation3], %s224_s19, %s224_s19, %s225_s20  }
  0x13   :  { %s226_s23 = smov [#allocation5]   ;;  %s173_s27 = scalar_lea.hbm %s284_s1, 256 }
  0x14   :  { %s39_s24 = sshll.u32 %s226_s23, 4  ;;  %p174_p8 = scmp.ne.s32.totalorder %s284_s1, %s173_s27  ;;  %s40_s24 = int_to_ptr.vmem [resolvable:$true] %s39_s24 }
  0x15   :  { %p177_p9 = scmp.lt.u32.totalorder %s173_s27, %s284_s1 }
  0x17   :  { %p179_p10 = pnand %p177_p9, %p174_p8 }
  0x19   :  { %182 = shalt.err (!%p179_p10)
}
  0x1a   :  { %s183_s4 = scalar_lea.vmem %s40_s24, 256  ;;  %p188_p12 = scmp.lt.s32.totalorder %s40_s24, %s40_s24 }
  0x1b   :  { %p184_p11 = scmp.ne.s32.totalorder %s40_s24, %s183_s4  ;;  %p189_p13 = scmp.lt.s32.totalorder %s183_s4, %s183_s4 }
  0x1d   :  { %p190_p0 = por %p189_p13, %p188_p12 }
  0x1f   :  { %p191_p1 = pnand %p190_p0, %p184_p11 }
  0x21   :  { %194 = shalt.err (!%p191_p1)
}
  0x22   :  { %45 = dma.hbm_to_vmem [thread:$0]  %s284_s1, 256, %s40_s24, [#allocation6], %s224_s19, %s224_s19, %s225_s20  }
  0x23   :  { %217 = dma.done.wait [#allocation3], 256  }
  0x24   :  { %218 = vsyncadd [#allocation3], 4294967040 }
  0x25   :  { %219 = dma.done.wait [#allocation6], 256  }
  0x26   :  { %220 = vsyncadd [#allocation6], 4294967040  ;;  %v75_v0 = vld [vmem:[#allocation2] sm:$0xff]  ;;  %v76_v1 = vld [vmem:[#allocation2 + $0x8] sm:$0xff]  ;;  %s227_s1 = smov [#allocation7]  }
  0x27   :  { %v77_v2 = vld [vmem:[#allocation5] sm:$0xff]  ;;  %v78_v3 = vld [vmem:[#allocation5 + $0x8] sm:$0xff]  ;;  %v89_v4 = vsub.f32 1.0, %v75_v0  ;;  %v90_v5 = vsub.f32 1.0, %v76_v1  ;;  %v99_v10 = vmul.f32 %v75_v0, %v75_v0  ;;  %v100_v11 = vmul.f32 %v76_v1, %v76_v1  ;;  %s127_s6 = sshll.u32 %s227_s1, 4  ;;  %s128_s6 = int_to_ptr.vmem [resolvable:$true] %s127_s6 }
  0x28   :  { %vm87_vm0 = vcmp.eq.f32.partialorder %v77_v2, 1.0  ;;  %vm88_vm1 = vcmp.eq.f32.partialorder %v78_v3, 1.0  ;;  %v101_v6 = vsub.f32 1.0, %v77_v2  ;;  %v102_v7 = vsub.f32 1.0, %v78_v3  ;;  %s195_s7 = scalar_lea.vmem %s128_s6, 128  ;;  %p200_p3 = scmp.lt.s32.totalorder %s128_s6, %s128_s6 }
  0x29   :  { %v91_v8 = vsel %vm87_vm0, %v75_v0, %v89_v4  ;;  %v92_v9 = vsel %vm88_vm1, %v76_v1, %v90_v5  ;;  %vm109_vm2 = vcmp.lt.f32.partialorder %v77_v2, 1.0  ;;  %vm110_vm3 = vcmp.lt.f32.partialorder %v78_v3, 1.0  ;;  %p196_p2 = scmp.ne.s32.totalorder %s128_s6, %s195_s7  ;;  %p201_p4 = scmp.lt.s32.totalorder %s195_s7, %s195_s7 }
  0x2a   :  { %147 = vlog2.f32 %v91_v8  ;;  %v103_v12 = vmul.f32 %v101_v6, %v101_v6  ;;  %v104_v13 = vmul.f32 %v102_v7, %v102_v7  ;;  %v97_v18 = vmul.f32 %v89_v4, %v89_v4 }
  0x2b   :  { %149 = vlog2.f32 %v92_v9  ;;  %v98_v19 = vmul.f32 %v90_v5, %v90_v5  ;;  %p202_p5 = por %p201_p4, %p200_p3 }
  0x2c   :  { %v105_v14 = vmul.f32 %v103_v12, %v103_v12  ;;  %v106_v15 = vmul.f32 %v104_v13, %v104_v13 }
  0x2d   :  { %p203_p6 = pnand %p202_p5, %p196_p2 }
  0x2e   :  { %v107_v16 = vmul.f32 %v105_v14, %v99_v10  ;;  %v108_v17 = vmul.f32 %v106_v15, %v100_v11 }
  0x30   :  { %v111_v20 = vsel %vm109_vm2, %v107_v16, 0.0  ;;  %v112_v21 = vsel %vm110_vm3, %v108_v17, 0.0 }
  0x31   :  { %v113_v23 = vsel %vm87_vm0, %v97_v18, %v111_v20  ;;  %v114_v26 = vsel %vm88_vm1, %v98_v19, %v112_v21 }
  0x34   :  { %v148_v22 = vpop.eup %147 }
  0x35   :  { %v150_v24 = vpop.eup %149  ;;  %v94_v25 = vmul.f32 0.6931472, %v148_v22 }
  0x36   :  { %v96_v27 = vmul.f32 0.6931472, %v150_v24 }
  0x37   :  { %v115_v28 = vmul.f32 %v113_v23, %v94_v25 }
  0x38   :  { %v116_v29 = vmul.f32 %v114_v26, %v96_v27 }
  0x3a   :  { %v118_v30 = vadd.f32 %v116_v29, %v115_v28 }
  0x3c   :  { %120 = vst [vmem:[#allocation7] sm:$0xff] %v118_v30 }
  0x3d   :  { %206 = shalt.err (!%p203_p6)
}
  0x3e   :  { %s207_s10 = scalar_lea.hbm %s285_s2, 128 }
  0x3f   :  { %p208_p7 = scmp.ne.s32.totalorder %s285_s2, %s207_s10  ;;  %p211_p8 = scmp.lt.u32.totalorder %s207_s10, %s285_s2 }
  0x41   :  { %p213_p9 = pnand %p211_p8, %p208_p7 }
  0x43   :  { %216 = shalt.err (!%p213_p9)
}
  0x44   :  { %130 = dma.vmem_to_hbm [thread:$0]  %s128_s6, 128, %s285_s2, [#allocation4]  }
  0x45   :  { %221 = dma.done.wait [#allocation4], 128  }
  0x46   :  { %222 = vsyncadd [#allocation4], 4294967168 }
  0x47   :  { %134 = vsyncpa [#allocation3], 1 }
  0x48   :  { %135 = vsyncpa [#allocation6], 1 }
  0x49   :  { %136 = vsyncpa [#allocation4], 1 }

</bundles_post_ra>
